<compile_context>
chip_gen: v6e
topology: v6e:2x2x1
jax: 0.10.0
libtpu: 0.0.40
codegen_flags: <defaults>
</compile_context>

<pallas_src>
import jax
import jax.numpy as jnp
from jax.experimental import pallas as pl
from jax.experimental.pallas import tpu as pltpu


def _se3d_kernel(x_ref, w1_ref, w2_ref, o_ref):
    # x_ref block: (1, c, Ts, hw); w1: (hidden, c) f32; w2: (c, hidden) f32.
    x = x_ref[0]                                              # (c, Ts, hw), input dtype

    # Squeeze: spatial mean per (channel, s-slab), accumulated in f32.
    pool = jnp.mean(x.astype(jnp.float32), axis=-1)           # (c, Ts)

    # Excitation, batched over the Ts slabs resident in this block.
    h = jnp.dot(w1_ref[...], pool,
                preferred_element_type=jnp.float32)           # (hidden, Ts)
    h = h * jax.nn.sigmoid(h)                                 # SiLU
    g = jax.nn.sigmoid(jnp.dot(w2_ref[...], h,
                               preferred_element_type=jnp.float32))  # (c, Ts)

    # Scale: broadcast gate over hw.  Elementwise path stays in the input
    # dtype (bf16-native on v6e/v7x; exact for the f32 test config).
    # NOTE: on v5e with bf16 inputs, upcast x to f32 here instead (no bf16 VPU).
    o_ref[0] = (x * g.astype(x.dtype)[:, :, None]).astype(o_ref.dtype)


def _choose_ts(c, s, hw, itemsize, target_bytes=4 << 20):
    """How many s-slabs to fuse per block: big enough to amortize per-step
    overhead, small enough for a v7x-safe VMEM budget, dividing s and
    satisfying the sublane BlockSpec constraint (Ts % 8 == 0 or Ts == s)."""
    per_s = c * hw * itemsize
    max_ts = max(1, target_bytes // per_s)
    if s <= max_ts:
        return s
    fallback = None
    for ts in range(int(max_ts), 0, -1):
        if s % ts == 0:
            if ts % 8 == 0:
                return ts
            if fallback is None:
                fallback = ts
    # TODO(synk): support non-dividing Ts with masked tail blocks if the
    # divisor constraint ever forces a degenerate tile here.
    return fallback if fallback is not None else s


def squeeze_excitation_3d(x, w1, w2):
    """x: (b, c, s, h, w); w1: (hidden, c); w2: (c, hidden).  Returns x * gate."""
    b, c, s, hh, ww = x.shape
    hw = hh * ww
    hidden = w1.shape[0]
    itemsize = jnp.dtype(x.dtype).itemsize

    # Native layout, no transpose: (b, c, s, h, w) -> (b, c, s, h*w) is free.
    xr = x.reshape(b, c, s, hw)

    ts = _choose_ts(c, s, hw, itemsize)
    grid = (b, s // ts)

    # Weights are tiny and constant across the grid; cast once in the wrapper.
    w1f = w1.astype(jnp.float32)
    w2f = w2.astype(jnp.float32)

    # Explicit VMEM budget: 2x double-buffered input tile + 2x output tile
    # + weights + headroom, floored at 32 MiB (safe on v5e/v6e/v7x).
    tile_bytes = c * ts * hw * itemsize
    vmem_need = 4 * tile_bytes + w1f.nbytes + w2f.nbytes + (2 << 20)
    vmem_limit = int(min(max(vmem_need, 32 << 20), 56 << 20))

    cost = pl.CostEstimate(
        flops=int(4 * b * s * hidden * c + 3 * b * c * s * hw),
        transcendentals=int(b * s * (hidden + c)),
        bytes_accessed=int(2 * x.size * itemsize + w1f.nbytes + w2f.nbytes),
    )

    out = pl.pallas_call(
        _se3d_kernel,
        out_shape=jax.ShapeDtypeStruct((b, c, s, hw), x.dtype),
        grid=grid,
        in_specs=[
            pl.BlockSpec((1, c, ts, hw), lambda i, j: (i, 0, j, 0)),
            pl.BlockSpec(w1f.shape, lambda i, j: (0, 0)),
            pl.BlockSpec(w2f.shape, lambda i, j: (0, 0)),
        ],
        out_specs=pl.BlockSpec((1, c, ts, hw), lambda i, j: (i, 0, j, 0)),
        compiler_params=pltpu.CompilerParams(
            dimension_semantics=("parallel", "parallel"),
            vmem_limit_bytes=vmem_limit,
        ),
        cost_estimate=cost,
    )(xr, w1f, w2f)

    # (b, c, s, h*w) -> (b, c, s, h, w): free reshape, no transpose.
    return out.reshape(b, c, s, hh, ww)


def _reference(x, w1, w2):
    # pure-JAX reference mirroring the PyTorch module
    pool = jnp.mean(x, axis=(3, 4))                    # (b, c, s)
    pool = jnp.transpose(pool, (0, 2, 1))              # (b, s, c)
    h = pool @ w1.T                                    # Linear(dim -> hidden), no bias
    h = h * jax.nn.sigmoid(h)                          # SiLU
    g = jax.nn.sigmoid(h @ w2.T)                       # Linear(hidden -> dim), no bias
    g = jnp.transpose(g, (0, 2, 1))[..., None, None]   # (b, c, s, 1, 1)
    return x * g


if __name__ == "__main__":
    # Module config: dim = 32, shrinkage_rate = 0.25 -> hidden_dim = 8
    dim, shrinkage = 32, 0.25
    hidden = int(dim * shrinkage)
    b, s, hh, ww = 2, 4, 8, 8

    key = jax.random.PRNGKey(0)
    kx, k1, k2 = jax.random.split(key, 3)
    x = jax.random.normal(kx, (b, dim, s, hh, ww), dtype=jnp.float32)
    # deterministic synthetic weights (nn.Linear weight shapes: (out, in))
    w1 = jax.random.normal(k1, (hidden, dim), dtype=jnp.float32) * 0.1
    w2 = jax.random.normal(k2, (dim, hidden), dtype=jnp.float32) * 0.1

    out = squeeze_excitation_3d(x, w1, w2)
    out = jax.block_until_ready(out)

    ref = _reference(x, w1, w2)
    assert out.shape == x.shape and out.dtype == x.dtype
    assert jnp.allclose(out, ref, atol=1e-5, rtol=1e-5), "mismatch vs reference"

    print("KERNEL_OK")
</pallas_src>

<mosaic_0001>
module attributes {stable_mosaic.version = 11 : i64} {
  func.func @_se3d_kernel(%arg0: i32, %arg1: i32, %arg2: memref<1x32x4x64xf32, #tpu.memory_space<vmem>>, %arg3: memref<8x32xf32, #tpu.memory_space<vmem>>, %arg4: memref<32x8xf32, #tpu.memory_space<vmem>>, %arg5: memref<1x32x4x64xf32, #tpu.memory_space<vmem>>) attributes {dimension_semantics = [#tpu.dimension_semantics<parallel>, #tpu.dimension_semantics<parallel>], iteration_bounds = array<i64: 2, 1>, scalar_prefetch = 0 : i64, scratch_operands = 0 : i64, tpu.core_type = #tpu.core_type<tc>, window_params = [{transform_indices = @transform_0, window_bounds = array<i64: 1, 32, 4, 64>}, {pipeline_mode = #tpu.pipeline_mode<synchronous>, transform_indices = @transform_1, window_bounds = array<i64: 8, 32>}, {pipeline_mode = #tpu.pipeline_mode<synchronous>, transform_indices = @transform_2, window_bounds = array<i64: 32, 8>}, {transform_indices = @transform_3, window_bounds = array<i64: 1, 32, 4, 64>}]} {
    %c0 = arith.constant 0 : index
    %c0_0 = arith.constant 0 : index
    %c0_1 = arith.constant 0 : index
    %c0_2 = arith.constant 0 : index
    %0 = vector.load %arg2[%c0, %c0_0, %c0_1, %c0_2] : memref<1x32x4x64xf32, #tpu.memory_space<vmem>>, vector<1x32x4x64xf32>
    %1 = vector.shape_cast %0 : vector<1x32x4x64xf32> to vector<32x4x64xf32>
    %cst = arith.constant dense<0.000000e+00> : vector<32x4xf32>
    %2 = vector.multi_reduction <add>, %1, %cst [2] : vector<32x4x64xf32> to vector<32x4xf32>
    %cst_3 = arith.constant 6.400000e+01 : f32
    %3 = vector.broadcast %cst_3 : f32 to vector<32x4xf32>
    %4 = arith.divf %2, %3 : vector<32x4xf32>
    %c0_4 = arith.constant 0 : index
    %c0_5 = arith.constant 0 : index
    %5 = vector.load %arg3[%c0_4, %c0_5] : memref<8x32xf32, #tpu.memory_space<vmem>>, vector<8x32xf32>
    %cst_6 = arith.constant dense<0.000000e+00> : vector<8x4xf32>
    %6 = tpu.matmul %5, %4, %cst_6 {dimension_numbers = #tpu.dot_dimension_numbers<[1], [0], [0], [1], [0, 0, 1, 1], [], []>} : vector<8x32xf32>, vector<32x4xf32>, vector<8x4xf32> -> vector<8x4xf32>
    %7 = arith.negf %6 : vector<8x4xf32>
    %8 = math.exp %7 : vector<8x4xf32>
    %cst_7 = arith.constant 1.000000e+00 : f32
    %9 = vector.broadcast %cst_7 : f32 to vector<8x4xf32>
    %10 = arith.addf %9, %8 : vector<8x4xf32>
    %11 = arith.divf %9, %10 : vector<8x4xf32>
    %12 = arith.mulf %6, %11 : vector<8x4xf32>
    %c0_8 = arith.constant 0 : index
    %c0_9 = arith.constant 0 : index
    %13 = vector.load %arg4[%c0_8, %c0_9] : memref<32x8xf32, #tpu.memory_space<vmem>>, vector<32x8xf32>
    %cst_10 = arith.constant dense<0.000000e+00> : vector<32x4xf32>
    %14 = tpu.matmul %13, %12, %cst_10 {dimension_numbers = #tpu.dot_dimension_numbers<[1], [0], [0], [1], [0, 0, 1, 1], [], []>} : vector<32x8xf32>, vector<8x4xf32>, vector<32x4xf32> -> vector<32x4xf32>
    %15 = arith.negf %14 : vector<32x4xf32>
    %16 = math.exp %15 : vector<32x4xf32>
    %cst_11 = arith.constant 1.000000e+00 : f32
    %17 = vector.broadcast %cst_11 : f32 to vector<32x4xf32>
    %18 = arith.addf %17, %16 : vector<32x4xf32>
    %19 = arith.divf %17, %18 : vector<32x4xf32>
    %20 = vector.shape_cast %19 : vector<32x4xf32> to vector<32x4x1xf32>
    %21 = vector.broadcast %20 : vector<32x4x1xf32> to vector<32x4x64xf32>
    %22 = arith.mulf %1, %21 : vector<32x4x64xf32>
    %c0_12 = arith.constant 0 : index
    %c0_13 = arith.constant 0 : index
    %c0_14 = arith.constant 0 : index
    %c0_15 = arith.constant 0 : index
    %23 = vector.load %arg5[%c0_12, %c0_13, %c0_14, %c0_15] : memref<1x32x4x64xf32, #tpu.memory_space<vmem>>, vector<1x32x4x64xf32>
    %24 = vector.shape_cast %23 : vector<1x32x4x64xf32> to vector<32x4x64xf32>
    %25 = vector.shape_cast %22 : vector<32x4x64xf32> to vector<1x32x4x64xf32>
    tpu.vector_store %arg5[%c0_12, %c0_13, %c0_14, %c0_15], %25 {strides = array<i32>} : memref<1x32x4x64xf32, #tpu.memory_space<vmem>>, vector<1x32x4x64xf32>,
    return
  }
  func.func @transform_0(%arg0: i32, %arg1: i32) -> (i32, i32, i32, i32) {
    %c0_i32 = arith.constant 0 : i32
    %c0_i32_0 = arith.constant 0 : i32
    %c0_i32_1 = arith.constant 0 : i32
    return %arg0, %c0_i32, %arg1, %c0_i32_0 : i32, i32, i32, i32
  }
  func.func @transform_1(%arg0: i32, %arg1: i32) -> (i32, i32) {
    %c0_i32 = arith.constant 0 : i32
    %c0_i32_0 = arith.constant 0 : i32
    %c0_i32_1 = arith.constant 0 : i32
    return %c0_i32, %c0_i32_0 : i32, i32
  }
  func.func @transform_2(%arg0: i32, %arg1: i32) -> (i32, i32) {
    %c0_i32 = arith.constant 0 : i32
    %c0_i32_0 = arith.constant 0 : i32
    %c0_i32_1 = arith.constant 0 : i32
    return %c0_i32, %c0_i32_0 : i32, i32
  }
  func.func @transform_3(%arg0: i32, %arg1: i32) -> (i32, i32, i32, i32) {
    %c0_i32 = arith.constant 0 : i32
    %c0_i32_0 = arith.constant 0 : i32
    %c0_i32_1 = arith.constant 0 : i32
    return %arg0, %c0_i32, %arg1, %c0_i32_0 : i32, i32, i32, i32
  }
}

</mosaic_0001>

<bundles_post_ra>
// kernel: tpu_custom_call.1
= control target key start
LH: loop header
LB: loop body
LE: loop exit
PB: predicated region body
PF: predicated region fallthrough
CT: control target
= control target key end

     0   :  { %8 = vsyncpa [#allocation3], 0  ;;  %s1991_s0 = inlined_call_operand.hbm [shape: f32[2,32,4,64], index: 0, kind: input, shape index: {}]   ;;  %s1992_s1 = inlined_call_operand.vmem [shape: f32[8,32], index: 1, kind: input, shape index: {}]   ;;  %s1993_s2 = inlined_call_operand.vmem [shape: f32[32,8], index: 2, kind: input, shape index: {}]   ;;  %s1994_s3 = inlined_call_operand.hbm [shape: f32[2,32,4,64], index: 3, kind: output, shape index: {}]  }
   0x1   :  { %10 = vsyncpa [#allocation3 + $0x1], 0 }
   0x2   :  { %11 = vsyncpa [#allocation4], 0 }
   0x3   :  { %13 = vsyncpa [#allocation4 + $0x1], 0  ;;  %s1447_s12 = smov 0   ;;  %s1449_s13 = smov 0  }
   0x4   :  { %s1451_s14 = smov 0   ;;  %s1453_s15 = smov 0  }
   0x5   :  { %s1455_s16 = smov 0   ;;  %s1457_s17 = smov 0  }
   0x6 LB: > { %s1165_s18 = sadd.s32 4294967295, %s1417_s17   ;;  %s1166_s19 = sadd.s32 4294967294, %s1417_s17   ;;  %s1417_s17 = sphi %s1457_s17, %s19_s17   ;;  %s1413_s16 = sphi %s1455_s16, %s2011_s16   ;;  %s1409_s15 = sphi %s1453_s15, %s2010_s15   ;;  %s1405_s14 = sphi %s1451_s14, %s2009_s14   ;;  %s1401_s13 = sphi %s1449_s13, %s2008_s13   ;;  %s1397_s12 = sphi %s1447_s12, %s2007_s12  }
   0x7   : > { %s31_s20 = sadd.s32 1, %s1413_s16  ;;  %s40_s21 = sadd.s32 1, %s1405_s14 }
   0x8   : > { %p33_p0 = scmp.ge.s32.totalorder %s31_s20, 2  ;;  %p47_p1 = scmp.ne.s32.totalorder %s1405_s14, %s1401_s13 }
   0x9   : > { %p48_p2 = scmp.eq.s32.totalorder %s1417_s17, 0  ;;  %p53_p3 = scmp.ne.s32.totalorder %s1401_s13, %s1397_s12 }
   0xa   : > { %s2013_s20 = smov (%p33_p0, %s31_s20), 0  ;;  %p54_p5 = scmp.eq.s32.totalorder %s1165_s18, 0 }
   0xb   : > { %p1488_p4 = por %p48_p2, %p47_p1  ;;  %s35_s23 = ssub.s32 %s1413_s16, %s2013_s20 }
   0xc   : > { %p121_p6 = scmp.eq.s32.totalorder %s1165_s18, 1  ;;  %p38_p7 = scmp.eq.s32.totalorder %s35_s23, 0 }
   0xd   : > { %p1494_p8 = por %p54_p5, %p53_p3  ;;  %p127_p10 = scmp.eq.s32.totalorder %s1166_s19, 1 }
   0xe   : > { %p1498_p9 = por %p121_p6, %p47_p1  ;;  %p1233_p13 = scmp.lt.s32.totalorder %s1417_s17, 2 }
   0xf   : > { %s1503_s26 = scalar_select %p38_p7, %s1405_s14, %s40_s21  }
  0x10   : > { %p1505_p11 = por %p127_p10, %p53_p3  ;;  %s153_s28 = sand.u32 1, %s1405_s14  }
  0x11   : > { %s1169_s29 = sshll.u32 %s153_s28, 7  ;;  %s1190_s30 = sshll.u32 %s1413_s16, 11 }
  0x12   : > { %s164_s6 = scalar_lea.hbm %s1991_s0, %s1190_s30  ;;  %s157_s7 = scalar_lea.vmem [#allocation2], %s1169_s29 }
  0x13   : > { %s165_s8 = sshll.u32 %s157_s7, 4  ;;  %p1518_p0 = pnand %p1233_p13, %p1488_p4  ;;  %s166_s8 = int_to_ptr.vmem [resolvable:$true] %s165_s8 }
  0x14   : > { %p1172_p1 = scmp.ge.s32.totalorder %s1417_s17, 1  ;;  %s154_s10 = scalar_lea.sflag [#allocation3], %s153_s28 }
  0x15   : > { %p1311_p2 = pneg %p1518_p0  ;;  %s1322_s11 = scalar_lea.vmem %s166_s8, 2048 }
  0x16   : > { %p1323_p3 = scmp.ne.s32.totalorder %s166_s8, %s1322_s11  ;;  %s1419_s18 = smov [#allocation2]  }
  0x17   : > { %s1327_s19 = sshll.u32 %s1419_s18, 4  ;;  %s1328_s19 = int_to_ptr.vmem [resolvable:$false] %s1327_s19 }
  0x18   : > { %p1325_p5 = pnand %p1323_p3, %p1311_p2  ;;  %s1329_s21 = scalar_lea.vmem %s1328_s19, 4096 }
  0x19   : > { %p1330_p7 = scmp.lt.s32.totalorder %s166_s8, %s1328_s19  ;;  %p1331_p10 = scmp.lt.s32.totalorder %s1329_s21, %s1322_s11 }
  0x1a   : > { %p1326_p6 = pneg %p1325_p5 }
  0x1b   : > { %p1332_p12 = por %p1331_p10, %p1330_p7 }
  0x1d   : > { %p1333_p4 = pnand %p1332_p12, %p1326_p6 }
  0x1f   : > { %1336 = shalt.err (!%p1333_p4)
}
  0x20   : > { %s1420_s22 = smov 64   ;;  %s1421_s23 = smov 4  }
  0x21   : > { %1228 = dma.hbm_to_vmem [thread:$0]  (!%p1518_p0), %s164_s6, 2048, %s166_s8, %s154_s10, %s1420_s22, %s1420_s22, %s1421_s23  }
  0x22   : > { %p173_p13 = scmp.lt.s32.totalorder %s1417_s17, 3 }
  0x24   : > { %p174_p2 = pnand %p1172_p1, %p173_p13 }
  0x26   : > { %177 = sbr.rel (%p174_p2) target bundleno = 905 (0x389), region = 32 }
  0x2b   : > { %s1531_s28 = sand.u32 1, %s1401_s13  }
  0x2c   : > { %s1173_s29 = sshll.u32 %s1531_s28, 7  ;;  %s180_s30 = scalar_lea.sflag [#allocation3], %s1531_s28 }
  0x2d   : > { %s1537_s4 = scalar_lea.vmem [#allocation2], %s1173_s29 }
  0x2e   : > { %1388 = dma.done.wait (%p1494_p8), %s180_s30, 2048  }
  0x2f   : > { %1390 = vsyncadd (%p1494_p8), %s180_s30, 4294965248  ;;  %vm238_vm0 = vcmask 519168   ;;  %v1544_v0 = vld [vmem:[%s1537_s4 + $0x68] sm:$0xf]  ;;  %v1547_v1 = vld [vmem:[%s1537_s4 + $0x60] sm:$0xf] }
  0x30   : > { %v1550_v2 = vld [vmem:[%s1537_s4 + $0x64] sm:$0xf]  ;;  %v317_v3 = vsel %vm238_vm0, %v1544_v0, 0.0  ;;  %v311_v4 = vsel %vm238_vm0, %v1547_v1, 0.0  ;;  %v1557_v5 = vld [vmem:[%s1537_s4 + $0x40] sm:$0xf] }
  0x31   : > { %318 = vadd.xlane.f32.xlu1 %v317_v3  ;;  %312 = vadd.xlane.f32.xlu0 %v311_v4  ;;  %v314_v6 = vsel %vm238_vm0, %v1550_v2, 0.0  ;;  %v287_v7 = vsel %vm238_vm0, %v1557_v5, 0.0  ;;  %v1564_v8 = vld [vmem:[%s1537_s4 + $0x44] sm:$0xf]  ;;  %v1567_v9 = vld [vmem:[%s1537_s4 + $0x6c] sm:$0xf] }
  0x32   : > { %v290_v10 = vsel %vm238_vm0, %v1564_v8, 0.0  ;;  %v320_v11 = vsel %vm238_vm0, %v1567_v9, 0.0  ;;  %v1574_v12 = vld [vmem:[%s1537_s4 + $0x48] sm:$0xf]  ;;  %v1577_v13 = vld [vmem:[%s1537_s4 + $0x70] sm:$0xf] }
  0x33   : > { %v293_v14 = vsel %vm238_vm0, %v1574_v12, 0.0  ;;  %v323_v15 = vsel %vm238_vm0, %v1577_v13, 0.0  ;;  %v1584_v16 = vld [vmem:[%s1537_s4 + $0x24] sm:$0xf]  ;;  %v1587_v17 = vld [vmem:[%s1537_s4 + $0x20] sm:$0xf] }
  0x34   : > { %v266_v18 = vsel %vm238_vm0, %v1584_v16, 0.0  ;;  %v263_v19 = vsel %vm238_vm0, %v1587_v17, 0.0  ;;  %v1594_v20 = vld [vmem:[%s1537_s4 + $0x74] sm:$0xf]  ;;  %v1597_v21 = vld [vmem:[%s1537_s4 + $0x4c] sm:$0xf] }
  0x35   : > { %315 = vadd.xlane.f32.xlu0 %v314_v6  ;;  %288 = vadd.xlane.f32.xlu1 %v287_v7  ;;  %v326_v22 = vsel %vm238_vm0, %v1594_v20, 0.0  ;;  %v296_v23 = vsel %vm238_vm0, %v1597_v21, 0.0  ;;  %v1604_v24 = vld [vmem:[%s1537_s4 + $0x50] sm:$0xf]  ;;  %v1607_v25 = vld [vmem:[%s1537_s4 + $0x28] sm:$0xf] }
  0x36   : > { %v299_v26 = vsel %vm238_vm0, %v1604_v24, 0.0  ;;  %v269_v27 = vsel %vm238_vm0, %v1607_v25, 0.0  ;;  %v1614_v28 = vld [vmem:[%s1537_s4 + $0x78] sm:$0xf]  ;;  %v1617_v29 = vld [vmem:[%s1537_s4] sm:$0xf] }
  0x37   : > { %v329_v30 = vsel %vm238_vm0, %v1614_v28, 0.0  ;;  %v239_v31 = vsel %vm238_vm0, %v1617_v29, 0.0  ;;  %v1624_v32 = vld [vmem:[%s1537_s4 + $0x4] sm:$0xf]  ;;  %v1627_v33 = vld [vmem:[%s1537_s4 + $0x2c] sm:$0xf] }
  0x38   : > { %v242_v34 = vsel %vm238_vm0, %v1624_v32, 0.0  ;;  %v272_v35 = vsel %vm238_vm0, %v1627_v33, 0.0  ;;  %v1634_v36 = vld [vmem:[%s1537_s4 + $0x54] sm:$0xf]  ;;  %v1637_v37 = vld [vmem:[%s1537_s4 + $0x7c] sm:$0xf] }
  0x39   : > { %291 = vadd.xlane.f32.xlu0 %v290_v10  ;;  %321 = vadd.xlane.f32.xlu1 %v320_v11  ;;  %2003 = vst [vmem:[#allocation8_spill] sm:$0xff] %v1637_v37  ;;  %v302_v38 = vsel %vm238_vm0, %v1634_v36, 0.0  ;;  %v332_v39 = vsel %vm238_vm0, %v1637_v37, 0.0  ;;  %v1644_v40 = vld [vmem:[%s1537_s4 + $0x8] sm:$0xf]  ;;  %v1995_v58 = vmov 0.0  }
  0x3a   : > { %v1647_v41 = vld [vmem:[%s1537_s4 + $0x30] sm:$0xf]  ;;  %v245_v42 = vsel %vm238_vm0, %v1644_v40, 0.0  ;;  %v1654_v44 = vld [vmem:[%s1537_s4 + $0x58] sm:$0xf]  ;;  %1202 = vmatprep.subr.mxu0 %v1995_v58  ;;  %vm1423_vm1 = vmmov 0  }
  0x3b   : > { %v275_v43 = vsel %vm238_vm0, %v1647_v41, 0.0  ;;  %v1657_v45 = vld [vmem:[%s1537_s4 + $0xc] sm:$0xf]  ;;  %v305_v46 = vsel %vm238_vm0, %v1654_v44, 0.0  ;;  %v1664_v48 = vld [vmem:[%s1537_s4 + $0x34] sm:$0xf]  ;;  %1210 = vmatprep.mubr.msk.f32.mxu0 %vm1423_vm1, %v1995_v58 }
  0x3c   : > { %v248_v47 = vsel %vm238_vm0, %v1657_v45, 0.0  ;;  %v1667_v49 = vld [vmem:[%s1537_s4 + $0x5c] sm:$0xf]  ;;  %v278_v50 = vsel %vm238_vm0, %v1664_v48, 0.0  ;;  %v1674_v52 = vld [vmem:[%s1537_s4 + $0x10] sm:$0xf] }
  0x3d   : > { %294 = vadd.xlane.f32.xlu0 %v293_v14  ;;  %324 = vadd.xlane.f32.xlu1 %v323_v15  ;;  %v308_v51 = vsel %vm238_vm0, %v1667_v49, 0.0  ;;  %v1677_v53 = vld [vmem:[%s1537_s4 + $0x38] sm:$0xf]  ;;  %v251_v54 = vsel %vm238_vm0, %v1674_v52, 0.0  ;;  %v1684_v56 = vld [vmem:[%s1537_s4 + $0x14] sm:$0xf] }
  0x3e   : > { %v281_v55 = vsel %vm238_vm0, %v1677_v53, 0.0  ;;  %v1687_v57 = vld [vmem:[%s1537_s4 + $0x3c] sm:$0xf]  ;;  %v254_v59 = vsel %vm238_vm0, %v1684_v56, 0.0  ;;  %v1695_v61 = vld [vmem:[%s1537_s4 + $0x18] sm:$0xf] }
  0x3f   : > { %v284_v60 = vsel %vm238_vm0, %v1687_v57, 0.0  ;;  %v1698_v62 = vld [vmem:[%s1537_s4 + $0x1c] sm:$0xf]  ;;  %v257_v63 = vsel %vm238_vm0, %v1695_v61, 0.0  ;;  %vm531_vm2 = vcmask 1041409   ;;  %vm533_vm3 = vcmask 1042434  }
  0x40   : > { %v260_v3 = vsel %vm238_vm0, %v1698_v62, 0.0  ;;  %vm535_vm4 = vcmask 1043459   ;;  %vm537_vm5 = vcmask 1044484   ;;  %vm539_vm6 = vcmask 1045509   ;;  %s1840_s21 = scalar_lea.vmem [#allocation5], %s1173_s29  ;;  %s1191_s22 = sshll.u32 %s1409_s15, 11 }
  0x41   : > { %267 = vadd.xlane.f32.xlu1 %v266_v18  ;;  %264 = vadd.xlane.f32.xlu0 %v263_v19  ;;  %vm541_vm7 = vcmask 1046534   ;;  %vm543_vm8 = vcmask 1047559   ;;  %vm570_vm9 = vcmask 261120   ;;  %vm655_vm10 = vcmask 64512   ;;  %s1080_s23 = sshll.u32 %s1840_s21, 4  ;;  %s1938_s4 = scalar_lea.hbm %s1994_s3, %s1191_s22  ;;  %s1940_s23 = int_to_ptr.vmem [resolvable:$true] %s1080_s23 }
  0x42   : > { %s1066_s24 = scalar_lea.sflag [#allocation4], %s1531_s28  ;;  %s1337_s15 = scalar_lea.vmem %s1940_s23, 2048 }
  0x43   : > { %p1338_p8 = scmp.ne.s32.totalorder %s1940_s23, %s1337_s15  ;;  %s1424_s5 = smov [#allocation5]  }
  0x44   : > { %s1341_s6 = sshll.u32 %s1424_s5, 4  ;;  %s1342_s6 = int_to_ptr.vmem [resolvable:$false] %s1341_s6 }
  0x45   : > { %327 = vadd.xlane.f32.xlu1 %v326_v22  ;;  %297 = vadd.xlane.f32.xlu0 %v296_v23  ;;  %v401_v23 = vlaneseq  ;;  %p1339_p12 = pnand %p1338_p8, %p1498_p9  ;;  %s1343_s7 = scalar_lea.vmem %s1342_s6, 4096 }
  0x46   : > { %p1344_p1 = scmp.lt.s32.totalorder %s1940_s23, %s1342_s6  ;;  %p1345_p3 = scmp.lt.s32.totalorder %s1343_s7, %s1337_s15 }
  0x47   : > { %p1340_p0 = pneg %p1339_p12 }
  0x48   : > { %p1346_p5 = por %p1345_p3, %p1344_p1 }
  0x49   : > { %300 = vadd.xlane.f32.xlu1 %v299_v26  ;;  %270 = vadd.xlane.f32.xlu0 %v269_v27 }
  0x4a   : > { %p1347_p6 = pnand %p1346_p5, %p1340_p0 }
  0x4d   : > { %330 = vadd.xlane.f32.xlu0 %v329_v30  ;;  %240 = vadd.xlane.f32.xlu1 %v239_v31  ;;  %v402_v30 = vand.u32 127, %v401_v23  ;;  %v1707_v31 = vshrl.u32 %v401_v23, 7 }
  0x51   : > { %243 = vadd.xlane.f32.xlu0 %v242_v34  ;;  %273 = vadd.xlane.f32.xlu1 %v272_v35 }
  0x55   : > { %303 = vadd.xlane.f32.xlu0 %v302_v38  ;;  %333 = vadd.xlane.f32.xlu1 %v332_v39  ;;  %v1710_v39 = vsub.s32 %v402_v30, %v1707_v31 }
  0x59   : > { %246 = vadd.xlane.f32.xlu0 %v245_v42  ;;  %276 = vadd.xlane.f32.xlu1 %v275_v43 }
  0x5d   : > { %306 = vadd.xlane.f32.xlu0 %v305_v46  ;;  %249 = vadd.xlane.f32.xlu1 %v248_v47 }
  0x61   : > { %279 = vadd.xlane.f32.xlu0 %v278_v50  ;;  %309 = vadd.xlane.f32.xlu1 %v308_v51 }
  0x65   : > { %252 = vadd.xlane.f32.xlu0 %v251_v54  ;;  %282 = vadd.xlane.f32.xlu1 %v281_v55 }
  0x69   : > { %255 = vadd.xlane.f32.xlu0 %v254_v59  ;;  %285 = vadd.xlane.f32.xlu1 %v284_v60 }
  0x6d   : > { %258 = vadd.xlane.f32.xlu0 %v257_v63  ;;  %261 = vadd.xlane.f32.xlu1 %v260_v3 }
  0xba   : > { %v319_v4 = vpop.xlane.xlu1 %318  ;;  %v313_v6 = vpop.xlane.xlu0 %312 }
  0xbb   : > { %v360_v42 = vmul.f32 0.015625, %v313_v6  ;;  %v362_v51 = vmul.f32 0.015625, %v319_v4 }
  0xbd   : > { %v502_v55 = vrot.slane %v360_v42, %v1710_v39  ;;  %v510_v23 = vrot.slane %v362_v51, %v1710_v39 }
  0xbe   : > { %v316_v7 = vpop.xlane.xlu0 %315  ;;  %v289_v10 = vpop.xlane.xlu1 %288 }
  0xbf   : > { %v361_v38 = vmul.f32 0.015625, %v316_v7 }
  0xc1   : > { %v506_v47 = vrot.slane %v361_v38, %v1710_v39 }
  0xc2   : > { %v292_v11 = vpop.xlane.xlu0 %291  ;;  %v322_v14 = vpop.xlane.xlu1 %321 }
  0xc3   : > { %v363_v50 = vmul.f32 0.015625, %v322_v14  ;;  %v559_v7 = vsel %vm531_vm2, %v506_v47, %v502_v55 }
  0xc4   : > { %v560_v14 = vsel %vm533_vm3, %v510_v23, %v559_v7  ;;  %v352_v23 = vmul.f32 0.015625, %v289_v10 }
  0xc5   : > { %v514_v6 = vrot.slane %v363_v50, %v1710_v39  ;;  %v353_v50 = vmul.f32 0.015625, %v292_v11 }
  0xc6   : > { %v295_v15 = vpop.xlane.xlu0 %294  ;;  %v325_v18 = vpop.xlane.xlu1 %324 }
  0xc7   : > { %v364_v54 = vmul.f32 0.015625, %v325_v18  ;;  %v561_v42 = vsel %vm535_vm4, %v514_v6, %v560_v14  ;;  %v354_v55 = vmul.f32 0.015625, %v295_v15  ;;  %v474_v14 = vrot.slane %v353_v50, %v1710_v39 }
  0xc8   : > { %v470_v15 = vrot.slane %v352_v23, %v1710_v39 }
  0xc9   : > { %v518_v30 = vrot.slane %v364_v54, %v1710_v39  ;;  %v478_v11 = vrot.slane %v354_v55, %v1710_v39 }
  0xca   : > { %v268_v19 = vpop.xlane.xlu1 %267  ;;  %v1705_v22 = vpop.xlane.xlu0 %264 }
  0xcb   : > { %v562_v47 = vsel %vm537_vm5, %v518_v30, %v561_v42  ;;  %v345_v10 = vmul.f32 0.015625, %v268_v19 }
  0xcd   : > { %v442_v19 = vrot.slane %v345_v10, %v1710_v39 }
  0xce   : > { %v328_v26 = vpop.xlane.xlu1 %327  ;;  %v298_v27 = vpop.xlane.xlu0 %297 }
  0xcf   : > { %v365_v59 = vmul.f32 0.015625, %v328_v26  ;;  %v355_v58 = vmul.f32 0.015625, %v298_v27 }
  0xd1   : > { %v522_v4 = vrot.slane %v365_v59, %v1710_v39 }
  0xd2   : > { %v301_v34 = vpop.xlane.xlu1 %300  ;;  %v271_v35 = vpop.xlane.xlu0 %270 }
  0xd3   : > { %v563_v54 = vsel %vm539_vm6, %v522_v4, %v562_v47  ;;  %v356_v6 = vmul.f32 0.015625, %v301_v34  ;;  %v552_v34 = vsel %vm531_vm2, %v474_v14, %v470_v15  ;;  %v346_v50 = vmul.f32 0.015625, %v271_v35 }
  0xd4   : > { %v553_v47 = vsel %vm533_vm3, %v478_v11, %v552_v34 }
  0xd5   : > { %v486_v27 = vrot.slane %v356_v6, %v1710_v39  ;;  %v446_v11 = vrot.slane %v346_v50, %v1710_v39 }
  0xd6   : > { %v331_v43 = vpop.xlane.xlu0 %330  ;;  %v1712_v46 = vpop.xlane.xlu1 %240 }
  0xd7   : > { %v366_v60 = vmul.f32 0.015625, %v331_v43 }
  0xd9   : > { %v526_v18 = vrot.slane %v366_v60, %v1710_v39 }
  0xda   : > { %v244_v63 = vpop.xlane.xlu0 %243  ;;  %v274_v3 = vpop.xlane.xlu1 %273 }
  0xdb   : > { %v564_v60 = vsel %vm541_vm7, %v526_v18, %v563_v54  ;;  %v337_v15 = vmul.f32 0.015625, %v244_v63 }
  0xde   : > { %v304_v26 = vpop.xlane.xlu0 %303  ;;  %v334_v38 = vpop.xlane.xlu1 %333 }
  0xdf   : > { %v367_v43 = vmul.f32 0.015625, %v334_v38  ;;  %v357_v30 = vmul.f32 0.015625, %v304_v26  ;;  %v2004_v38 = vmov 0.0  }
  0xe1   : > { %v530_v51 = vrot.slane %v367_v43, %v1710_v39  ;;  %v482_v43 = vrot.slane %v355_v58, %v1710_v39  ;;  %v490_v26 = vrot.slane %v357_v30, %v1710_v39  ;;  %v347_v58 = vmul.f32 0.015625, %v274_v3 }
  0xe2   : > { %v247_v59 = vpop.xlane.xlu0 %246  ;;  %v277_v7 = vpop.xlane.xlu1 %276 }
  0xe3   : > { %v565_v37 = vsel %vm543_vm8, %v530_v51, %v564_v60  ;;  %v554_v60 = vsel %vm535_vm4, %v482_v43, %v553_v47  ;;  %v348_v14 = vmul.f32 0.015625, %v277_v7  ;;  %v450_v43 = vrot.slane %v347_v58, %v1710_v39 }
  0xe4   : > { %1203 = vmatpush3.msra.mxu0 %v565_v37  ;;  %v344_v37 = vmul.f32 0.015625, %v1705_v22  ;;  %v555_v6 = vsel %vm537_vm5, %v486_v27, %v554_v60  ;;  %v338_v10 = vmul.f32 0.015625, %v247_v59  ;;  %v336_v27 = vmul.f32 0.015625, %v1712_v46 }
  0xe5   : > { %1204 = vmatprep.subr.mxu0 %v2004_v38  ;;  %v556_v35 = vsel %vm539_vm6, %v490_v26, %v555_v6  ;;  %v410_v59 = vrot.slane %v337_v15, %v1710_v39 }
  0xe6   : > { %v307_v42 = vpop.xlane.xlu0 %306  ;;  %v250_v4 = vpop.xlane.xlu1 %249  ;;  %v438_v22 = vrot.slane %v344_v37, %v1710_v39  ;;  %v454_v37 = vrot.slane %v348_v14, %v1710_v39 }
  0xe7   : > { %v358_v18 = vmul.f32 0.015625, %v307_v42 }
  0xe8   : > { %v545_v26 = vsel %vm531_vm2, %v442_v19, %v438_v22  ;;  %v406_v19 = vrot.slane %v336_v27, %v1710_v39 }
  0xe9   : > { %v494_v51 = vrot.slane %v358_v18, %v1710_v39 }
  0xea   : > { %v280_v54 = vpop.xlane.xlu0 %279  ;;  %v310_v55 = vpop.xlane.xlu1 %309 }
  0xeb   : > { %v359_v23 = vmul.f32 0.015625, %v310_v55  ;;  %v349_v42 = vmul.f32 0.015625, %v280_v54  ;;  %v557_v3 = vsel %vm541_vm7, %v494_v51, %v556_v35  ;;  %v339_v54 = vmul.f32 0.015625, %v250_v4 }
  0xec   : > { %v546_v51 = vsel %vm533_vm3, %v446_v11, %v545_v26  ;;  %v414_v4 = vrot.slane %v338_v10, %v1710_v39  ;;  %v532_v11 = vsel %vm531_vm2, %v410_v59, %v406_v19  ;;  %v653_v19 = vld [vmem:[%s1993_s2 + $0x10] sm:$0xff] }
  0xed   : > { %v498_v30 = vrot.slane %v359_v23, %v1710_v39  ;;  %v458_v63 = vrot.slane %v349_v42, %v1710_v39  ;;  %v547_v46 = vsel %vm535_vm4, %v450_v43, %v546_v51  ;;  %v418_v22 = vrot.slane %v339_v54, %v1710_v39  ;;  %v368_v51 = vld [vmem:[%s1992_s1] sm:$0xff] }
  0xee   : > { %v253_v18 = vpop.xlane.xlu0 %252  ;;  %v283_v34 = vpop.xlane.xlu1 %282  ;;  %v548_v14 = vsel %vm537_vm5, %v454_v37, %v547_v46  ;;  %v534_v43 = vsel %vm533_vm3, %v414_v4, %v532_v11 }
  0xef   : > { %v350_v47 = vmul.f32 0.015625, %v283_v34  ;;  %v558_v7 = vsel %vm543_vm8, %v498_v30, %v557_v3  ;;  %v340_v50 = vmul.f32 0.015625, %v253_v18  ;;  %v549_v35 = vsel %vm539_vm6, %v458_v63, %v548_v14  ;;  %v654_v14 = vld [vmem:[%s1993_s2 + $0x18] sm:$0xff] }
  0xf0   : > { %1205 = vmatpush3.msra.mxu0 %v558_v7  ;;  %v536_v27 = vsel %vm535_vm4, %v418_v22, %v534_v43 }
  0xf1   : > { %1206 = vmatprep.subr.mxu0 %v2004_v38  ;;  %v462_v55 = vrot.slane %v350_v47, %v1710_v39  ;;  %v422_v42 = vrot.slane %v340_v50, %v1710_v39 }
  0xf2   : > { %v256_v60 = vpop.xlane.xlu0 %255  ;;  %v286_v58 = vpop.xlane.xlu1 %285 }
  0xf3   : > { %v341_v23 = vmul.f32 0.015625, %v256_v60  ;;  %v351_v6 = vmul.f32 0.015625, %v286_v58  ;;  %v550_v3 = vsel %vm541_vm7, %v462_v55, %v549_v35  ;;  %v538_v37 = vsel %vm537_vm5, %v422_v42, %v536_v27  ;;  %v651_v55 = vld [vmem:[%s1993_s2] sm:$0xff] }
  0xf4   : > { %1215 = vmatprep.mubr.msk.f32.mxu1 %vm655_vm10, %v651_v55 }
  0xf5   : > { %v466_v30 = vrot.slane %v351_v6, %v1710_v39  ;;  %v426_v15 = vrot.slane %v341_v23, %v1710_v39  ;;  %v652_v6 = vld [vmem:[%s1993_s2 + $0x8] sm:$0xff] }
  0xf6   : > { %v259_v18 = vpop.xlane.xlu0 %258  ;;  %v262_v34 = vpop.xlane.xlu1 %261 }
  0xf7   : > { %v342_v10 = vmul.f32 0.015625, %v259_v18  ;;  %v343_v47 = vmul.f32 0.015625, %v262_v34  ;;  %v551_v7 = vsel %vm543_vm8, %v466_v30, %v550_v3  ;;  %v540_v63 = vsel %vm539_vm6, %v426_v15, %v538_v37 }
  0xf8   : > { %1207 = vmatpush3.msra.mxu0 %v551_v7  ;;  %v1805_v37 = vsub.s32 3, %v1707_v31 }
  0xf9   : > { %v430_v54 = vrot.slane %v342_v10, %v1710_v39  ;;  %v434_v26 = vrot.slane %v343_v47, %v1710_v39  ;;  %1208 = vmatprep.subr.mxu0 %v2004_v38  ;;  %v1799_v10 = vsub.s32 1, %v1707_v31  ;;  %v1802_v47 = vsub.s32 0, %v1707_v31 }
  0xfb   : > { %v542_v50 = vsel %vm541_vm7, %v430_v54, %v540_v63  ;;  %v1808_v54 = vsub.s32 2, %v1707_v31 }
  0xfc   : > { %v544_v59 = vsel %vm543_vm8, %v434_v26, %v542_v50 }
  0xfd   : > { %1209 = vmatpush3.msra.mxu0 %v544_v59  ;;  %v1813_v59 = vsub.s32 5, %v1707_v31 }
  0xfe   : > { %1211 = vmatmul.mubr.msk.f32.vlgmr.msra.gmra.mxu0 %vm570_vm9, %v368_v51 }
 0x1be   : > { %v640_v39 = vpop.f32.mrf.mxu0 }
 0x1bf   : > { %v1176_v38 = vmul.f32 -1.442695, %v640_v39 }
 0x1c0   : > { %v1212_v60 = vpop.f32.mrf.mxu0 }
 0x1c1   : > { %1289 = vpow2.f32 %v1176_v38  ;;  %v807_v38 = vsub.s32 4, %v1707_v31 }
 0x1ce   : > { %v1290_v58 = vpop.eup %1289 }
 0x1cf   : > { %v647_v46 = vadd.f32 1.0, %v1290_v58 }
 0x1d1   : > { %1291 = vrcp.f32 %v647_v46 }
 0x1de   : > { %v1292_v4 = vpop.eup %1291 }
 0x1df   : > { %v650_v23 = vmul.f32 %v1292_v4, %v640_v39  ;;  %v828_v4 = vsub.s32 7, %v1707_v31 }
 0x1e1   : > { %1213 = vmatprep.subr.mxu1 %v650_v23 }
 0x1e2   : > { %1214 = vmatpush3.msra.mxu1 %v650_v23  ;;  %v821_v23 = vsub.s32 6, %v1707_v31 }
 0x1e3   : > { %1216 = vmatmul.mubr.msk.f32.vlgmr.msra.gmra.mxu1 %vm655_vm10, %v652_v6 }
 0x1e4   : > { %1218 = vmatprep.mubr.msk.f32.mxu1 %vm655_vm10, %v653_v19 }
 0x1e7   : > { %1219 = vmatmul.mubr.msk.f32.gmra.mxu1 %vm655_vm10, %v654_v14 }
 0x2a3   : > { %v1217_v22 = vpop.f32.mrf.mxu1 }
 0x2a4   : > { %v1182_v42 = vmul.f32 -1.442695, %v1217_v22 }
 0x2a5   : > { %v734_v30 = vpop.f32.mrf.mxu1 }
 0x2a6   : > { %1293 = vpow2.f32 %v1182_v42  ;;  %v1181_v35 = vmul.f32 -1.442695, %v734_v30 }
 0x2a7   : > { %v1220_v15 = vpop.f32.mrf.mxu1 }
 0x2a8   : > { %1295 = vpow2.f32 %v1181_v35  ;;  %v1184_v34 = vmul.f32 -1.442695, %v1220_v15 }
 0x2a9   : > { %v744_v7 = vpop.f32.mrf.mxu1 }
 0x2aa   : > { %v1183_v50 = vmul.f32 -1.442695, %v744_v7 }
 0x2b3   : > { %v1294_v11 = vpop.eup %1293 }
 0x2b4   : > { %v766_v18 = vadd.f32 1.0, %v1294_v11 }
 0x2b5   : > { %v1296_v3 = vpop.eup %1295 }
 0x2b6   : > { %1297 = vrcp.f32 %v766_v18  ;;  %v765_v43 = vadd.f32 1.0, %v1296_v3 }
 0x2b7   : > { %1299 = vpow2.f32 %v1184_v34 }
 0x2b8   : > { %1301 = vrcp.f32 %v765_v43 }
 0x2b9   : > { %1303 = vpow2.f32 %v1183_v50 }
 0x2c3   : > { %v1298_v27 = vpop.eup %1297 }
 0x2c4   : > { %v843_v26 = vrot.slane %v1298_v27, %v1799_v10  ;;  %v836_v63 = vrot.slane %v1298_v27, %v1802_v47  ;;  %v1300_v51 = vpop.eup %1299  ;;  %v857_v55 = vrot.slane %v1298_v27, %v1805_v37  ;;  %v850_v39 = vrot.slane %v1298_v27, %v1808_v54 }
 0x2c5   : > { %v768_v60 = vadd.f32 1.0, %v1300_v51  ;;  %v871_v58 = vrot.slane %v1298_v27, %v1813_v59  ;;  %v864_v46 = vrot.slane %v1298_v27, %v807_v38  ;;  %v885_v6 = vrot.slane %v1298_v27, %v828_v4  ;;  %v1302_v14 = vpop.eup %1301 }
 0x2c6   : > { %845 = vbcast.lane.b32.xlu1 %v843_v26, 256  ;;  %838 = vbcast.lane.b32.xlu0 %v836_v63, 256  ;;  %v878_v19 = vrot.slane %v1298_v27, %v821_v23  ;;  %v787_v22 = vrot.slane %v1302_v14, %v1799_v10  ;;  %v780_v42 = vrot.slane %v1302_v14, %v1802_v47  ;;  %v1304_v30 = vpop.eup %1303 }
 0x2c7   : > { %1305 = vrcp.f32 %v768_v60  ;;  %v767_v35 = vadd.f32 1.0, %v1304_v30  ;;  %v794_v11 = vrot.slane %v1302_v14, %v1808_v54  ;;  %v808_v15 = vrot.slane %v1302_v14, %v807_v38 }
 0x2c8   : > { %v801_v18 = vrot.slane %v1302_v14, %v1805_v37  ;;  %v822_v34 = vrot.slane %v1302_v14, %v821_v23  ;;  %v815_v43 = vrot.slane %v1302_v14, %v1813_v59  ;;  %v829_v27 = vrot.slane %v1302_v14, %v828_v4 }
 0x2c9   : > { %1307 = vrcp.f32 %v767_v35 }
 0x2ca   : > { %859 = vbcast.lane.b32.xlu1 %v857_v55, 256  ;;  %852 = vbcast.lane.b32.xlu0 %v850_v39, 256 }
 0x2ce   : > { %873 = vbcast.lane.b32.xlu1 %v871_v58, 256  ;;  %866 = vbcast.lane.b32.xlu0 %v864_v46, 256 }
 0x2d2   : > { %887 = vbcast.lane.b32.xlu1 %v885_v6, 256  ;;  %880 = vbcast.lane.b32.xlu0 %v878_v19, 256 }
 0x2d4   : > { %v1306_v31 = vpop.eup %1305 }
 0x2d5   : > { %v948_v3 = vrot.slane %v1306_v31, %v1802_v47  ;;  %v962_v7 = vrot.slane %v1306_v31, %v1808_v54  ;;  %v955_v26 = vrot.slane %v1306_v31, %v1799_v10  ;;  %v976_v63 = vrot.slane %v1306_v31, %v807_v38 }
 0x2d6   : > { %789 = vbcast.lane.b32.xlu1 %v787_v22, 256  ;;  %782 = vbcast.lane.b32.xlu0 %v780_v42, 256  ;;  %v1308_v50 = vpop.eup %1307  ;;  %v969_v51 = vrot.slane %v1306_v31, %v1805_v37  ;;  %v983_v39 = vrot.slane %v1306_v31, %v1813_v59  ;;  %v990_v14 = vrot.slane %v1306_v31, %v821_v23 }
 0x2d7   : > { %v892_v55 = vrot.slane %v1308_v50, %v1802_v47  ;;  %v906_v60 = vrot.slane %v1308_v50, %v1808_v54  ;;  %v899_v58 = vrot.slane %v1308_v50, %v1799_v10  ;;  %v920_v46 = vrot.slane %v1308_v50, %v807_v38 }
 0x2d8   : > { %v913_v6 = vrot.slane %v1308_v50, %v1805_v37  ;;  %v934_v19 = vrot.slane %v1308_v50, %v821_v23  ;;  %v927_v47 = vrot.slane %v1308_v50, %v1813_v59  ;;  %v941_v22 = vrot.slane %v1308_v50, %v828_v4 }
 0x2d9   : > { %v997_v54 = vrot.slane %v1306_v31, %v828_v4 }
 0x2da   : > { %796 = vbcast.lane.b32.xlu1 %v794_v11, 256  ;;  %810 = vbcast.lane.b32.xlu0 %v808_v15, 256 }
 0x2de   : > { %803 = vbcast.lane.b32.xlu1 %v801_v18, 256  ;;  %824 = vbcast.lane.b32.xlu0 %v822_v34, 256 }
 0x2e2   : > { %817 = vbcast.lane.b32.xlu1 %v815_v43, 256  ;;  %950 = vbcast.lane.b32.xlu0 %v948_v3, 256 }
 0x2e6   : > { %831 = vbcast.lane.b32.xlu1 %v829_v27, 256  ;;  %964 = vbcast.lane.b32.xlu0 %v962_v7, 256 }
 0x2ea   : > { %957 = vbcast.lane.b32.xlu1 %v955_v26, 256  ;;  %978 = vbcast.lane.b32.xlu0 %v976_v63, 256 }
 0x2ee   : > { %971 = vbcast.lane.b32.xlu1 %v969_v51, 256  ;;  %894 = vbcast.lane.b32.xlu0 %v892_v55, 256 }
 0x2f2   : > { %985 = vbcast.lane.b32.xlu1 %v983_v39, 256  ;;  %908 = vbcast.lane.b32.xlu0 %v906_v60, 256 }
 0x2f6   : > { %901 = vbcast.lane.b32.xlu1 %v899_v58, 256  ;;  %922 = vbcast.lane.b32.xlu0 %v920_v46, 256 }
 0x2fa   : > { %915 = vbcast.lane.b32.xlu1 %v913_v6, 256  ;;  %936 = vbcast.lane.b32.xlu0 %v934_v19, 256 }
 0x2fe   : > { %929 = vbcast.lane.b32.xlu1 %v927_v47, 256  ;;  %992 = vbcast.lane.b32.xlu0 %v990_v14, 256 }
 0x302   : > { %943 = vbcast.lane.b32.xlu1 %v941_v22, 256 }
 0x306   : > { %999 = vbcast.lane.b32.xlu1 %v997_v54, 256 }
 0x338   : > { %v846_v42 = vpop.permute.xlu1 %845  ;;  %v839_v10 = vpop.permute.xlu0 %838 }
 0x339   : > { %v1010_v38 = vmul.f32 %v846_v42, %v1584_v16  ;;  %v1009_v30 = vmul.f32 %v839_v10, %v1587_v17 }
 0x33b   : > { %1042 = vst.msk [vmem:[%s1840_s21 + $0x24] sm:$0xf] %vm238_vm0, %v1010_v38  ;;  %1041 = vst.msk [vmem:[%s1840_s21 + $0x20] sm:$0xf] %vm238_vm0, %v1009_v30 }
 0x33c   : > { %v860_v37 = vpop.permute.xlu1 %859  ;;  %v853_v59 = vpop.permute.xlu0 %852 }
 0x33d   : > { %v1012_v16 = vmul.f32 %v860_v37, %v1627_v33  ;;  %v1011_v17 = vmul.f32 %v853_v59, %v1607_v25 }
 0x33f   : > { %1044 = vst.msk [vmem:[%s1840_s21 + $0x2c] sm:$0xf] %vm238_vm0, %v1012_v16  ;;  %1043 = vst.msk [vmem:[%s1840_s21 + $0x28] sm:$0xf] %vm238_vm0, %v1011_v17 }
 0x340   : > { %v874_v4 = vpop.permute.xlu1 %873  ;;  %v867_v23 = vpop.permute.xlu0 %866 }
 0x341   : > { %v1014_v35 = vmul.f32 %v874_v4, %v1664_v48  ;;  %v1013_v11 = vmul.f32 %v867_v23, %v1647_v41 }
 0x343   : > { %1046 = vst.msk [vmem:[%s1840_s21 + $0x34] sm:$0xf] %vm238_vm0, %v1014_v35  ;;  %1045 = vst.msk [vmem:[%s1840_s21 + $0x30] sm:$0xf] %vm238_vm0, %v1013_v11 }
 0x344   : > { %v888_v15 = vpop.permute.xlu1 %887  ;;  %v881_v33 = vpop.permute.xlu0 %880 }
 0x345   : > { %v1016_v25 = vmul.f32 %v888_v15, %v1687_v57  ;;  %v1015_v31 = vmul.f32 %v881_v33, %v1677_v53 }
 0x347   : > { %1048 = vst.msk [vmem:[%s1840_s21 + $0x3c] sm:$0xf] %vm238_vm0, %v1016_v25  ;;  %1047 = vst.msk [vmem:[%s1840_s21 + $0x38] sm:$0xf] %vm238_vm0, %v1015_v31 }
 0x348   : > { %v790_v18 = vpop.permute.xlu1 %789  ;;  %v783_v48 = vpop.permute.xlu0 %782 }
 0x349   : > { %v1002_v41 = vmul.f32 %v790_v18, %v1624_v32  ;;  %v1001_v34 = vmul.f32 %v783_v48, %v1617_v29 }
 0x34b   : > { %1034 = vst.msk [vmem:[%s1840_s21 + $0x4] sm:$0xf] %vm238_vm0, %v1002_v41  ;;  %1033 = vst.msk [vmem:[%s1840_s21] sm:$0xf] %vm238_vm0, %v1001_v34 }
 0x34c   : > { %v797_v3 = vpop.permute.xlu1 %796  ;;  %v811_v57 = vpop.permute.xlu0 %810 }
 0x34d   : > { %v1003_v53 = vmul.f32 %v797_v3, %v1644_v40  ;;  %v1005_v43 = vmul.f32 %v811_v57, %v1674_v52 }
 0x34f   : > { %1035 = vst.msk [vmem:[%s1840_s21 + $0x8] sm:$0xf] %vm238_vm0, %v1003_v53  ;;  %1037 = vst.msk [vmem:[%s1840_s21 + $0x10] sm:$0xf] %vm238_vm0, %v1005_v43 }
 0x350   : > { %v804_v7 = vpop.permute.xlu1 %803  ;;  %v825_v32 = vpop.permute.xlu0 %824 }
 0x351   : > { %v1004_v29 = vmul.f32 %v804_v7, %v1657_v45  ;;  %v1007_v27 = vmul.f32 %v825_v32, %v1695_v61 }
 0x353   : > { %1036 = vst.msk [vmem:[%s1840_s21 + $0xc] sm:$0xf] %vm238_vm0, %v1004_v29  ;;  %1039 = vst.msk [vmem:[%s1840_s21 + $0x18] sm:$0xf] %vm238_vm0, %v1007_v27 }
 0x354   : > { %v818_v26 = vpop.permute.xlu1 %817  ;;  %v951_v40 = vpop.permute.xlu0 %950 }
 0x355   : > { %v1006_v52 = vmul.f32 %v818_v26, %v1684_v56  ;;  %v1025_v63 = vmul.f32 %v951_v40, %v1547_v1 }
 0x357   : > { %1038 = vst.msk [vmem:[%s1840_s21 + $0x14] sm:$0xf] %vm238_vm0, %v1006_v52  ;;  %1057 = vst.msk [vmem:[%s1840_s21 + $0x60] sm:$0xf] %vm238_vm0, %v1025_v63 }
 0x358   : > { %v832_v50 = vpop.permute.xlu1 %831  ;;  %v965_v45 = vpop.permute.xlu0 %964 }
 0x359   : > { %v1008_v61 = vmul.f32 %v832_v50, %v1698_v62  ;;  %v1027_v51 = vmul.f32 %v965_v45, %v1544_v0 }
 0x35b   : > { %1040 = vst.msk [vmem:[%s1840_s21 + $0x1c] sm:$0xf] %vm238_vm0, %v1008_v61  ;;  %1059 = vst.msk [vmem:[%s1840_s21 + $0x68] sm:$0xf] %vm238_vm0, %v1027_v51 }
 0x35c   : > { %v958_v55 = vpop.permute.xlu1 %957  ;;  %v979_v56 = vpop.permute.xlu0 %978 }
 0x35d   : > { %v1026_v1 = vmul.f32 %v958_v55, %v1550_v2  ;;  %v1029_v39 = vmul.f32 %v979_v56, %v1577_v13 }
 0x35f   : > { %1058 = vst.msk [vmem:[%s1840_s21 + $0x64] sm:$0xf] %vm238_vm0, %v1026_v1  ;;  %1061 = vst.msk [vmem:[%s1840_s21 + $0x70] sm:$0xf] %vm238_vm0, %v1029_v39 }
 0x360   : > { %v972_v60 = vpop.permute.xlu1 %971  ;;  %v895_v62 = vpop.permute.xlu0 %894 }
 0x361   : > { %v1028_v0 = vmul.f32 %v972_v60, %v1567_v9  ;;  %v1017_v58 = vmul.f32 %v895_v62, %v1557_v5 }
 0x363   : > { %1060 = vst.msk [vmem:[%s1840_s21 + $0x6c] sm:$0xf] %vm238_vm0, %v1028_v0  ;;  %1049 = vst.msk [vmem:[%s1840_s21 + $0x40] sm:$0xf] %vm238_vm0, %v1017_v58 }
 0x364   : > { %v986_v46 = vpop.permute.xlu1 %985  ;;  %v909_v2 = vpop.permute.xlu0 %908 }
 0x365   : > { %v1030_v13 = vmul.f32 %v986_v46, %v1594_v20  ;;  %v1019_v6 = vmul.f32 %v909_v2, %v1574_v12 }
 0x367   : > { %1062 = vst.msk [vmem:[%s1840_s21 + $0x74] sm:$0xf] %vm238_vm0, %v1030_v13  ;;  %1051 = vst.msk [vmem:[%s1840_s21 + $0x48] sm:$0xf] %vm238_vm0, %v1019_v6 }
 0x368   : > { %v902_v19 = vpop.permute.xlu1 %901  ;;  %v923_v9 = vpop.permute.xlu0 %922 }
 0x369   : > { %v1018_v5 = vmul.f32 %v902_v19, %v1564_v8  ;;  %v1021_v47 = vmul.f32 %v923_v9, %v1604_v24 }
 0x36b   : > { %1050 = vst.msk [vmem:[%s1840_s21 + $0x44] sm:$0xf] %vm238_vm0, %v1018_v5  ;;  %1053 = vst.msk [vmem:[%s1840_s21 + $0x50] sm:$0xf] %vm238_vm0, %v1021_v47 }
 0x36c   : > { %v916_v20 = vpop.permute.xlu1 %915  ;;  %v937_v12 = vpop.permute.xlu0 %936 }
 0x36d   : > { %v1020_v14 = vmul.f32 %v916_v20, %v1597_v21  ;;  %v1023_v22 = vmul.f32 %v937_v12, %v1654_v44 }
 0x36f   : > { %1052 = vst.msk [vmem:[%s1840_s21 + $0x4c] sm:$0xf] %vm238_vm0, %v1020_v14  ;;  %1055 = vst.msk [vmem:[%s1840_s21 + $0x58] sm:$0xf] %vm238_vm0, %v1023_v22 }
 0x370   : > { %v930_v8 = vpop.permute.xlu1 %929  ;;  %v993_v24 = vpop.permute.xlu0 %992 }
 0x371   : > { %v1022_v54 = vmul.f32 %v930_v8, %v1634_v36  ;;  %v1031_v42 = vmul.f32 %v993_v24, %v1614_v28  ;;  %v2005_v28 = vld [vmem:[#allocation8_spill] sm:$0xff] }
 0x373   : > { %1054 = vst.msk [vmem:[%s1840_s21 + $0x54] sm:$0xf] %vm238_vm0, %v1022_v54  ;;  %1063 = vst.msk [vmem:[%s1840_s21 + $0x78] sm:$0xf] %vm238_vm0, %v1031_v42 }
 0x374   : > { %v944_v21 = vpop.permute.xlu1 %943 }
 0x375   : > { %v1024_v44 = vmul.f32 %v944_v21, %v1667_v49 }
 0x377   : > { %1056 = vst.msk [vmem:[%s1840_s21 + $0x5c] sm:$0xf] %vm238_vm0, %v1024_v44 }
 0x378   : > { %v1000_v10 = vpop.permute.xlu1 %999 }
 0x379   : > { %v1032_v36 = vmul.f32 %v1000_v10, %v2005_v28 }
 0x37b   : > { %1064 = vst.msk [vmem:[%s1840_s21 + $0x7c] sm:$0xf] %vm238_vm0, %v1032_v36 }
 0x37c   : > { %1350 = shalt.err (!%p1347_p6)
}
 0x37d   : > { %s1351_s8 = scalar_lea.hbm %s1938_s4, 2048  ;;  %s1355_s11 = scalar_lea.hbm %s1994_s3, 4096 }
 0x37e   : > { %p1352_p7 = scmp.ne.s32.totalorder %s1938_s4, %s1351_s8  ;;  %p1356_p13 = scmp.lt.s32.totalorder %s1938_s4, %s1994_s3 }
 0x37f   : > { %p1357_p2 = scmp.lt.s32.totalorder %s1355_s11, %s1351_s8 }
 0x380   : > { %p1353_p10 = pnand %p1352_p7, %p1498_p9 }
 0x381   : > { %p1358_p8 = por %p1357_p2, %p1356_p13 }
 0x382   : > { %p1354_p4 = pneg %p1353_p10 }
 0x384   : > { %p1359_p12 = pnand %p1358_p8, %p1354_p4 }
 0x386   : > { %1362 = shalt.err (!%p1359_p12)
}
 0x387   : > { %s1425_s21 = smov 64   ;;  %s1426_s22 = smov 4  }
 0x388   : > { %1223 = dma.vmem_to_hbm [thread:$0]  (%p1498_p9), %s1940_s23, 2048, %s1938_s4, %s1066_s24, %s1425_s21, %s1425_s21, %s1426_s22  }
 0x389 PF: > { %s1095_s29 = sand.u32 1, %s1397_s12   ;;  %p2006_p0 = scmp.ge.s32.totalorder %s1417_s17, 2 }
 0x38a   : > { %s1096_s30 = scalar_lea.sflag [#allocation4], %s1095_s29 }
 0x38b   : > { %p1230_p1 = pnand %p2006_p0, %p1505_p11 }
 0x38d   : > { %p1231_p3 = pneg %p1230_p1 }
 0x38f   : > { %1392 = dma.done.wait (%p1231_p3), %s1096_s30, 2048  }
 0x390   : > { %1394 = vsyncadd (%p1231_p3), %s1096_s30, 4294965248  ;;  %s19_s17 = sadd.s32 1, %s1417_s17   ;;  %s2007_s12 = smov %s1401_s13 }
 0x391   : > { %p16_p5 = scmp.ge.s32.totalorder %s19_s17, 4   ;;  %s2008_s13 = smov %s1405_s14 }
 0x392   : > { %s2009_s14 = smov %s1503_s26  ;;  %s2010_s15 = smov %s1413_s16 }
 0x393   : > { %s2011_s16 = smov %s2013_s20  ;;  %18 = sbr.rel (!%p16_p5) target bundleno = 6 (0x6), region = 77 }
 0x398   :  { %1101 = vsyncpa [#allocation3], 1 }
 0x399   :  { %1103 = vsyncpa [#allocation3 + $0x1], 1 }
 0x39a   :  { %1104 = vsyncpa [#allocation4], 1 }
 0x39b   :  { %1106 = vsyncpa [#allocation4 + $0x1], 1 }

</bundles_post_ra>
